<compile_context>
chip_gen: v7x
topology: tpu7x:2x2x1
jax: 0.10.0
libtpu: 0.0.40
codegen_flags: <defaults>
</compile_context>

<pallas_src>
import functools
import math

import jax
import jax.numpy as jnp
from jax.experimental import pallas as pl
from jax.experimental.pallas import tpu as pltpu


# ----------------------------------------------------------------------------
# Tiled linear kernel: y = x @ W^T + b   (weights stored pre-transposed)
# ----------------------------------------------------------------------------
def _linear_kernel(x_ref, w_ref, b_ref, o_ref):
    y = jnp.dot(x_ref[...], w_ref[...], preferred_element_type=jnp.float32)
    o_ref[...] = (y + b_ref[...]).astype(o_ref.dtype)


def _linear(x, w_t, b, *, tm_target=256):
    """x: (M, K), w_t: (K, N), b: (1, N) -> (M, N)."""
    M, K = x.shape
    _, N = w_t.shape
    tm = min(M, tm_target)
    if M % tm != 0:
        tm = M
    return pl.pallas_call(
        _linear_kernel,
        out_shape=jax.ShapeDtypeStruct((M, N), x.dtype),
        grid_spec=pltpu.PrefetchScalarGridSpec(
            num_scalar_prefetch=0,
            grid=(M // tm,),
            in_specs=[
                pl.BlockSpec((tm, K), lambda i: (i, 0)),
                pl.BlockSpec((K, N), lambda i: (0, 0)),
                pl.BlockSpec((1, N), lambda i: (0, 0)),
            ],
            out_specs=pl.BlockSpec((tm, N), lambda i: (i, 0)),
        ),
        compiler_params=pltpu.CompilerParams(dimension_semantics=("parallel",)),
    )(x, w_t, b)


# ----------------------------------------------------------------------------
# Flash-attention style core: grid = (B*h, q-tiles, kv-tiles)
# ----------------------------------------------------------------------------
def _flash_attn_kernel(q_ref, k_ref, v_ref, mask_ref, o_ref,
                       m_sc, l_sc, acc_sc, *, scale):
    ki = pl.program_id(2)

    @pl.when(ki == 0)
    def _():
        m_sc[...] = jnp.full_like(m_sc, -jnp.inf)
        l_sc[...] = jnp.zeros_like(l_sc)
        acc_sc[...] = jnp.zeros_like(acc_sc)

    q = q_ref[0]                       # (tq, d_k)
    k = k_ref[0]                       # (tk, d_k)
    v = v_ref[0]                       # (tk, d_k)
    keep = mask_ref[0] != 0            # (tq, tk)  int8 -> bool

    # QK^T: contract last axis of both operands (no explicit transpose / XLU).
    s = jax.lax.dot_general(q, k, (((1,), (1,)), ((), ())),
                            preferred_element_type=jnp.float32)
    s = s * jnp.float32(scale)
    # Same finite fill value as the PyTorch module (keeps fully-masked-row
    # semantics identical to the reference softmax).
    s = jnp.where(keep, s, jnp.float32(-1000000000.0))

    # Online softmax update.
    m_prev = m_sc[...]
    m_new = jnp.maximum(m_prev, jnp.max(s, axis=-1, keepdims=True))
    alpha = jnp.exp(m_prev - m_new)
    p = jnp.exp(s - m_new)

    l_sc[...] = alpha * l_sc[...] + jnp.sum(p, axis=-1, keepdims=True)
    acc_sc[...] = alpha * acc_sc[...] + jnp.dot(
        p.astype(v.dtype), v, preferred_element_type=jnp.float32)
    m_sc[...] = m_new

    @pl.when(ki == pl.num_programs(2) - 1)
    def _():
        o_ref[0] = (acc_sc[...] *
                    pl.reciprocal(l_sc[...], approx=True)).astype(o_ref.dtype)


def _pick_tile(n, target):
    t = min(n, target)
    return t if n % t == 0 else n


def _flash_attention(q, k, v, mask_i8, *, h, scale, out_dtype,
                     tq_target=256, tk_target=256):
    """q,k,v: (B*h, S, d_k); mask_i8: (B, S, S) int8 -> (B*h, S, d_k)."""
    BH, S, d_k = q.shape
    tq = _pick_tile(S, tq_target)
    tk = _pick_tile(S, tk_target)

    q_spec = pl.BlockSpec((1, tq, d_k), lambda bh, qi, ki: (bh, qi, 0))
    kv_spec = pl.BlockSpec((1, tk, d_k), lambda bh, qi, ki: (bh, ki, 0))
    mask_spec = pl.BlockSpec((1, tq, tk),
                             lambda bh, qi, ki, h=h: (bh // h, qi, ki))
    out_spec = pl.BlockSpec((1, tq, d_k), lambda bh, qi, ki: (bh, qi, 0))

    return pl.pallas_call(
        functools.partial(_flash_attn_kernel, scale=scale),
        out_shape=jax.ShapeDtypeStruct((BH, S, d_k), out_dtype),
        grid_spec=pltpu.PrefetchScalarGridSpec(
            num_scalar_prefetch=0,
            grid=(BH, S // tq, S // tk),
            in_specs=[q_spec, kv_spec, kv_spec, mask_spec],
            out_specs=out_spec,
            scratch_shapes=[
                pltpu.VMEM((tq, 1), jnp.float32),      # running max
                pltpu.VMEM((tq, 1), jnp.float32),      # running sum
                pltpu.VMEM((tq, d_k), jnp.float32),    # output accumulator
            ],
        ),
        compiler_params=pltpu.CompilerParams(
            dimension_semantics=("parallel", "parallel", "arbitrary")),
    )(q, k, v, mask_i8)


# ----------------------------------------------------------------------------
# Full MultiHeadedAttention.forward (eval mode)
# ----------------------------------------------------------------------------
def multi_headed_attention(query, key, value, mask, params, *, h,
                           compute_dtype=jnp.float32):
    B, S, D = query.shape
    assert D % h == 0
    d_k = D // h
    wq_t, bq, wk_t, bk, wv_t, bv, wo_t, bo = params

    def project_split(x, w_t, b):
        y = _linear(x.reshape(B * S, D), w_t, b)                 # (B*S, D)
        y = y.reshape(B, S, h, d_k).transpose(0, 2, 1, 3)        # (B, h, S, d_k)
        # On v6e/v7x pass compute_dtype=jnp.bfloat16 to halve K/V tile VMEM
        # and double MXU throughput (accumulation stays f32 in-kernel).
        return y.reshape(B * h, S, d_k).astype(compute_dtype)

    qh = project_split(query, wq_t, bq)
    kh = project_split(key, wk_t, bk)
    vh = project_split(value, wv_t, bv)

    mask_i8 = (mask != 0).astype(jnp.int8)

    ctx = _flash_attention(qh, kh, vh, mask_i8, h=h,
                           scale=1.0 / math.sqrt(d_k),
                           out_dtype=query.dtype)

    # Head concat (cheap layout op between pallas_calls), then output proj.
    ctx = ctx.reshape(B, h, S, d_k).transpose(0, 2, 1, 3).reshape(B, S, D)
    out = _linear(ctx.reshape(B * S, D), wo_t, bo)
    return out.reshape(B, S, D)


# ----------------------------------------------------------------------------
# Plain-JAX reference mirroring the PyTorch module (eval mode)
# ----------------------------------------------------------------------------
def multi_headed_attention_ref(query, key, value, mask, params, *, h):
    B, S, D = query.shape
    d_k = D // h
    wq_t, bq, wk_t, bk, wv_t, bv, wo_t, bo = params

    def proj(x, w_t, b):
        return x @ w_t + b

    def split_heads(x):
        return x.reshape(B, S, h, d_k).transpose(0, 2, 1, 3)

    q = split_heads(proj(query, wq_t, bq))
    k = split_heads(proj(key, wk_t, bk))
    v = split_heads(proj(value, wv_t, bv))

    scores = jnp.einsum("bhqd,bhkd->bhqk", q, k) / math.sqrt(d_k)
    scores = jnp.where(mask[:, None, :, :] == 0, -1000000000.0, scores)
    p = jax.nn.softmax(scores, axis=-1)
    x = jnp.einsum("bhqk,bhkd->bhqd", p, v)
    x = x.transpose(0, 2, 1, 3).reshape(B, S, D)
    return x @ wo_t + bo


def make_params(key, d_model):
    """Deterministic synthetic parameters for the 4 nn.Linear(d_model, d_model)."""
    keys = jax.random.split(key, 8)
    params = []
    for i in range(4):
        w = jax.random.normal(keys[2 * i], (d_model, d_model), jnp.float32) * 0.1
        b = jax.random.normal(keys[2 * i + 1], (1, d_model), jnp.float32) * 0.1
        params.append(w.T)   # store W^T so kernels compute x @ W^T + b
        params.append(b)
    return tuple(params)


if __name__ == "__main__":
    B, S, D, H = 2, 8, 32, 4   # batch, seq, d_model, heads  (d_k = 8)

    root = jax.random.PRNGKey(0)
    k_q, k_k, k_v, k_p = jax.random.split(root, 4)

    query = jax.random.normal(k_q, (B, S, D), jnp.float32)
    key_ = jax.random.normal(k_k, (B, S, D), jnp.float32)
    value = jax.random.normal(k_v, (B, S, D), jnp.float32)

    # causal mask (B, S, S): 1 = attend, 0 = masked
    causal = jnp.tril(jnp.ones((S, S), jnp.int32))
    mask = jnp.broadcast_to(causal, (B, S, S))

    params = make_params(k_p, D)

    out = multi_headed_attention(query, key_, value, mask, params, h=H)
    out = jax.block_until_ready(out)

    ref = multi_headed_attention_ref(query, key_, value, mask, params, h=H)
    assert out.shape == (B, S, D)
    assert jnp.allclose(out, ref, atol=5e-3, rtol=5e-3), "mismatch vs reference"

    print("KERNEL_OK")
</pallas_src>

<mosaic_0001>
module attributes {stable_mosaic.version = 11 : i64} {
  func.func @_linear_kernel(%arg0: i32, %arg1: memref<16x32xf32, #tpu.memory_space<vmem>>, %arg2: memref<32x32xf32, #tpu.memory_space<vmem>>, %arg3: memref<1x32xf32, #tpu.memory_space<vmem>>, %arg4: memref<16x32xf32, #tpu.memory_space<vmem>>) attributes {dimension_semantics = [#tpu.dimension_semantics<parallel>], iteration_bounds = array<i64: 1>, scalar_prefetch = 0 : i64, scratch_operands = 0 : i64, tpu.core_type = #tpu.core_type<tc>, window_params = [{transform_indices = @transform_0, window_bounds = array<i64: 16, 32>}, {pipeline_mode = #tpu.pipeline_mode<synchronous>, transform_indices = @transform_1, window_bounds = array<i64: 32, 32>}, {pipeline_mode = #tpu.pipeline_mode<synchronous>, transform_indices = @transform_2, window_bounds = array<i64: 1, 32>}, {transform_indices = @transform_3, window_bounds = array<i64: 16, 32>}]} {
    %c0 = arith.constant 0 : index
    %c0_0 = arith.constant 0 : index
    %0 = vector.load %arg1[%c0, %c0_0] : memref<16x32xf32, #tpu.memory_space<vmem>>, vector<16x32xf32>
    %c0_1 = arith.constant 0 : index
    %c0_2 = arith.constant 0 : index
    %1 = vector.load %arg2[%c0_1, %c0_2] : memref<32x32xf32, #tpu.memory_space<vmem>>, vector<32x32xf32>
    %cst = arith.constant dense<0.000000e+00> : vector<16x32xf32>
    %2 = tpu.matmul %0, %1, %cst {dimension_numbers = #tpu.dot_dimension_numbers<[1], [0], [0], [1], [0, 0, 1, 1], [], []>} : vector<16x32xf32>, vector<32x32xf32>, vector<16x32xf32> -> vector<16x32xf32>
    %c0_3 = arith.constant 0 : index
    %c0_4 = arith.constant 0 : index
    %3 = vector.load %arg3[%c0_3, %c0_4] : memref<1x32xf32, #tpu.memory_space<vmem>>, vector<1x32xf32>
    %4 = vector.broadcast %3 : vector<1x32xf32> to vector<16x32xf32>
    %5 = arith.addf %2, %4 : vector<16x32xf32>
    %c0_5 = arith.constant 0 : index
    %c0_6 = arith.constant 0 : index
    %6 = vector.load %arg4[%c0_5, %c0_6] : memref<16x32xf32, #tpu.memory_space<vmem>>, vector<16x32xf32>
    tpu.vector_store %arg4[%c0_5, %c0_6], %5 {strides = array<i32>} : memref<16x32xf32, #tpu.memory_space<vmem>>, vector<16x32xf32>,
    return
  }
  func.func @transform_0(%arg0: i32) -> (i32, i32) {
    %c0_i32 = arith.constant 0 : i32
    %c0_i32_0 = arith.constant 0 : i32
    return %arg0, %c0_i32 : i32, i32
  }
  func.func @transform_1(%arg0: i32) -> (i32, i32) {
    %c0_i32 = arith.constant 0 : i32
    %c0_i32_0 = arith.constant 0 : i32
    %c0_i32_1 = arith.constant 0 : i32
    return %c0_i32, %c0_i32_0 : i32, i32
  }
  func.func @transform_2(%arg0: i32) -> (i32, i32) {
    %c0_i32 = arith.constant 0 : i32
    %c0_i32_0 = arith.constant 0 : i32
    %c0_i32_1 = arith.constant 0 : i32
    return %c0_i32, %c0_i32_0 : i32, i32
  }
  func.func @transform_3(%arg0: i32) -> (i32, i32) {
    %c0_i32 = arith.constant 0 : i32
    %c0_i32_0 = arith.constant 0 : i32
    return %arg0, %c0_i32 : i32, i32
  }
}

</mosaic_0001>

<bundles_post_ra>
// kernel: tpu_custom_call.1
= control target key start
LH: loop header
LB: loop body
LE: loop exit
PB: predicated region body
PF: predicated region fallthrough
CT: control target
= control target key end

     0   :  { %8 = vsyncpa [#allocation3], 0  ;;  %s340_s0 = inlined_call_operand.hbm [shape: f32[16,32], index: 0, kind: input, shape index: {}]   ;;  %s341_s1 = inlined_call_operand.hbm [shape: f32[32,32], index: 1, kind: input, shape index: {}]   ;;  %s342_s2 = inlined_call_operand.vmem [shape: f32[1,32], index: 2, kind: input, shape index: {}]   ;;  %s343_s3 = inlined_call_operand.hbm [shape: f32[16,32], index: 3, kind: output, shape index: {}]  }
   0x1   :  { %9 = vsyncpa [#allocation6], 0 }
   0x2   :  { %10 = vsyncpa [#allocation4], 0  ;;  %s263_s12 = smov [#allocation2]   ;;  %s191_s16 = scalar_lea.hbm %s340_s0, 256 }
   0x3   :  { %s16_s13 = sshll.u32 %s263_s12, 4  ;;  %p192_p0 = scmp.ne.s32.totalorder %s340_s0, %s191_s16  ;;  %s17_s13 = int_to_ptr.vmem [resolvable:$true] %s16_s13 }
   0x4   :  { %p195_p1 = scmp.lt.u32.totalorder %s191_s16, %s340_s0 }
   0x6   :  { %p197_p2 = pnand %p195_p1, %p192_p0 }
   0x8   :  { %200 = shalt.err (!%p197_p2)
}
   0x9   :  { %s201_s21 = scalar_lea.vmem %s17_s13, 256  ;;  %p206_p4 = scmp.lt.s32.totalorder %s17_s13, %s17_s13 }
   0xa   :  { %p202_p3 = scmp.ne.s32.totalorder %s17_s13, %s201_s21  ;;  %p207_p5 = scmp.lt.s32.totalorder %s201_s21, %s201_s21 }
   0xc   :  { %p208_p6 = por %p207_p5, %p206_p4 }
   0xe   :  { %p209_p7 = pnand %p208_p6, %p202_p3 }
  0x10   :  { %212 = shalt.err (!%p209_p7)
}
  0x11   :  { %s264_s22 = smov 128   ;;  %s265_s23 = smov 8  }
  0x12   :  { %22 = dma.hbm_to_vmem [thread:$0]  %s340_s0, 256, %s17_s13, [#allocation3], %s264_s22, %s264_s22, %s265_s23  }
  0x13   :  { %s266_s26 = smov [#allocation5]   ;;  %s213_s30 = scalar_lea.hbm %s341_s1, 512 }
  0x14   :  { %s28_s27 = sshll.u32 %s266_s26, 4  ;;  %p214_p8 = scmp.ne.s32.totalorder %s341_s1, %s213_s30  ;;  %s29_s27 = int_to_ptr.vmem [resolvable:$true] %s28_s27 }
  0x15   :  { %p217_p9 = scmp.lt.u32.totalorder %s213_s30, %s341_s1 }
  0x17   :  { %p219_p10 = pnand %p217_p9, %p214_p8 }
  0x19   :  { %222 = shalt.err (!%p219_p10)
}
  0x1a   :  { %s223_s8 = scalar_lea.vmem %s29_s27, 512  ;;  %p228_p12 = scmp.lt.s32.totalorder %s29_s27, %s29_s27 }
  0x1b   :  { %p224_p11 = scmp.ne.s32.totalorder %s29_s27, %s223_s8  ;;  %p229_p13 = scmp.lt.s32.totalorder %s223_s8, %s223_s8 }
  0x1d   :  { %p230_p0 = por %p229_p13, %p228_p12 }
  0x1f   :  { %p231_p1 = pnand %p230_p0, %p224_p11 }
  0x21   :  { %234 = shalt.err (!%p231_p1)
}
  0x22   :  { %34 = dma.hbm_to_vmem [thread:$0]  %s341_s1, 512, %s29_s27, [#allocation6], %s264_s22, %s264_s22, %s265_s23  }
  0x23   :  { %257 = dma.done.wait [#allocation3], 256  }
  0x24   :  { %258 = vsyncadd [#allocation3], 4294967040 }
  0x25   :  { %259 = dma.done.wait [#allocation6], 512  }
  0x26   :  { %260 = vsyncadd [#allocation6], 4294966784  ;;  %vm56_vm0 = vcmask 261120   ;;  %v45_v0 = vld [vmem:[#allocation5] sm:$0xff]  ;;  %v46_v1 = vld [vmem:[#allocation5 + $0x8] sm:$0xff]  ;;  %s267_s11 = smov [#allocation7]  }
  0x27   :  { %v47_v2 = vld [vmem:[#allocation5 + $0x10] sm:$0xff]  ;;  %v178_v3 = vpack.c.bf16 %v46_v1, %v45_v0  ;;  %v48_v4 = vld [vmem:[#allocation5 + $0x18] sm:$0xff]  ;;  %s145_s12 = sshll.u32 %s267_s11, 4  ;;  %s146_s12 = int_to_ptr.vmem [resolvable:$true] %s145_s12 }
  0x28   :  { %v43_v5 = vld [vmem:[#allocation2] sm:$0xff]  ;;  %v182_v6 = vpack.c.bf16 %v48_v4, %v47_v2  ;;  %v44_v7 = vld [vmem:[#allocation2 + $0x8] sm:$0xff]  ;;  %s235_s13 = scalar_lea.vmem %s146_s12, 256  ;;  %p240_p3 = scmp.lt.s32.totalorder %s146_s12, %s146_s12 }
  0x29   :  { %175 = vmatprep.mubr.msk.f32.mxu0 %vm56_vm0, %v43_v5  ;;  %179 = vmatprep.subr.bf16.mxu0 %v178_v3  ;;  %v158_v8 = vld [vmem:[%s342_s2] ss:$0 sm:$0xff]  ;;  %p236_p2 = scmp.ne.s32.totalorder %s146_s12, %s235_s13  ;;  %p241_p4 = scmp.lt.s32.totalorder %s235_s13, %s235_s13 }
  0x2a   :  { %181 = vmatpush3.bf16.msra.mxu0 %v178_v3 }
  0x2b   :  { %183 = vmatprep.subr.bf16.mxu0 %v182_v6  ;;  %p242_p5 = por %p241_p4, %p240_p3 }
  0x2d   :  { %p243_p6 = pnand %p242_p5, %p236_p2 }
  0x2e   :  { %185 = vmatpush3.bf16.msra.mxu0 %v182_v6 }
  0x31   :  { %176 = vmatmul.mubr.msk.f32.vlgmr.msra.gmra.mrb[0].mxu0 %vm56_vm0, %v44_v7 }
 0x104   :  { %v177_v9 = vpop.f32.mrb[0].mxu0 }
 0x105   :  { %v135_v10 = vadd.f32 %v177_v9, %v158_v8  ;;  %v129_v11 = vpop.f32.mrb[1].mxu0 }
 0x106   :  { %v130_v12 = vadd.f32 %v158_v8, %v129_v11 }
 0x107   :  { %139 = vst.msk [vmem:[#allocation7 + $0x8] sm:$0xff] %vm56_vm0, %v135_v10 }
 0x108   :  { %138 = vst.msk [vmem:[#allocation7] sm:$0xff] %vm56_vm0, %v130_v12 }
 0x109   :  { %246 = shalt.err (!%p243_p6)
}
 0x10a   :  { %s247_s15 = scalar_lea.hbm %s343_s3, 256 }
 0x10b   :  { %p248_p7 = scmp.ne.s32.totalorder %s343_s3, %s247_s15  ;;  %p251_p8 = scmp.lt.u32.totalorder %s247_s15, %s343_s3 }
 0x10d   :  { %p253_p9 = pnand %p251_p8, %p248_p7 }
 0x10f   :  { %256 = shalt.err (!%p253_p9)
}
 0x110   :  { %151 = dma.vmem_to_hbm [thread:$0]  %s146_s12, 256, %s343_s3, [#allocation4], %s264_s22, %s264_s22, %s265_s23  }
 0x111   :  { %261 = dma.done.wait [#allocation4], 256  }
 0x112   :  { %262 = vsyncadd [#allocation4], 4294967040 }
 0x113   :  { %155 = vsyncpa [#allocation3], 1 }
 0x114   :  { %156 = vsyncpa [#allocation6], 1 }
 0x115   :  { %157 = vsyncpa [#allocation4], 1 }

</bundles_post_ra>
